<compile_context>
chip_gen: v7x
topology: tpu7x:2x2x1
jax: 0.10.0
libtpu: 0.0.40
codegen_flags: <defaults>
</compile_context>

<pallas_src>
import math
from collections import deque

import numpy as np

import jax
import jax.numpy as jnp
from jax.experimental import pallas as pl
from jax.experimental.pallas import tpu as pltpu


EMOTION_VA_MAP = {
    'admiration': (0.6, 0.3), 'amusement': (0.8, 0.4), 'anger': (-0.6, 0.8),
    'annoyance': (-0.4, 0.4), 'approval': (0.4, 0.2), 'caring': (0.6, 0.3),
    'confusion': (-0.2, 0.3), 'curiosity': (0.3, 0.4), 'desire': (0.5, 0.6),
    'disappointment': (-0.5, -0.2), 'disapproval': (-0.4, 0.3), 'disgust': (-0.7, 0.4),
    'embarrassment': (-0.4, 0.4), 'excitement': (0.7, 0.8), 'fear': (-0.7, 0.7),
    'gratitude': (0.7, 0.3), 'grief': (-0.8, -0.4), 'joy': (0.8, 0.6),
    'love': (0.9, 0.5), 'nervousness': (-0.3, 0.7), 'optimism': (0.6, 0.4),
    'pride': (0.7, 0.5), 'realization': (0.2, 0.3), 'relief': (0.4, -0.2),
    'remorse': (-0.6, -0.3), 'sadness': (-0.7, -0.3), 'surprise': (0.3, 0.7),
    'neutral': (0.0, 0.0),
}
N_EMOTIONS = len(EMOTION_VA_MAP)
EMOTION_LABELS = list(EMOTION_VA_MAP.keys())


# --------------------------------------------------------------------------------------
# Kernel 1: fused modulation  out = (x + embedding_row * intensity) * (1 + v * sigmoid(a))
# --------------------------------------------------------------------------------------
def _modulate_kernel(params_ref, emb_ref, x_ref, o_ref):
    # params (SMEM f32[3]): [valence, arousal, emotion_intensity]
    valence = params_ref[0]
    arousal = params_ref[1]
    intensity = params_ref[2]

    ones = jnp.ones((1, 1), jnp.float32)
    gain = 1.0 / (1.0 + jnp.exp(-(arousal * ones)))        # sigmoid(arousal) on EUP, (1,1)
    mod = 1.0 + valence * gain                             # (1,1), broadcast below

    ctx = emb_ref[...].astype(jnp.float32) * intensity     # (1, W) emotional context row
    xt = x_ref[...].astype(jnp.float32)                    # (tm, W)
    o_ref[...] = ((xt + ctx) * mod).astype(o_ref.dtype)


# --------------------------------------------------------------------------------------
# Kernel 2: emotion influence  probs = softmax(scores_row) @ row_softmax(transition)
#           (transition row-softmax is precomputed in the wrapper — parameter-only)
# --------------------------------------------------------------------------------------
def _emotion_influence_kernel(scores_ref, trans_ref, probs_ref):
    s = scores_ref[...]                                     # (1, N) lane-major raw scores
    e = jnp.exp(s - jnp.max(s, axis=-1, keepdims=True))
    ev = e / jnp.sum(e, axis=-1, keepdims=True)             # softmax along lanes
    probs_ref[...] = jnp.dot(ev, trans_ref[...],
                             preferred_element_type=jnp.float32)   # (1, N)


# --------------------------------------------------------------------------------------
# Tiling helpers
# --------------------------------------------------------------------------------------
def _fold_factor(rows, h):
    """Fold k rows into the lane axis so k*h % 128 == 0 (lane-dense stores)."""
    if h % 128 == 0:
        return 1
    k = 128 // math.gcd(h, 128)
    return k if (k <= rows and rows % k == 0) else 1


def _pick_block_rows(rows, row_bytes):
    """~2 MiB lane-dense row blocks; force >= 2 grid blocks for arrays > 512 KiB."""
    total = rows * row_bytes
    if total <= (512 << 10):
        return rows                           # small array: one full-extent block
    target = 2 << 20                          # v5e-safe with in/out double buffering
    tm = max(8, min(rows, target // max(row_bytes, 1)))
    tm = max(8, (tm // 8) * 8)                # sublane-aligned
    if tm >= rows:
        # whole array fits one tile -> split so v7x megacore / pipelining engage
        half = max(8, ((rows // 2) // 8) * 8)
        tm = half if half < rows else rows
    return tm


# --------------------------------------------------------------------------------------
# Wrappers
# --------------------------------------------------------------------------------------
@jax.jit
def emotional_modulate(x, valence, arousal, emb_row, intensity):
    orig_shape = x.shape
    h = orig_shape[-1]
    rows = x.size // h

    # Fold rows into lanes for lane-dense stores when H is small / unaligned.
    k = _fold_factor(rows, h)
    rows_f = rows // k
    w = k * h
    xf = x.reshape(rows_f, w)                 # native dtype; lane axis = k*hidden

    params = jnp.stack([
        jnp.asarray(valence, jnp.float32),
        jnp.asarray(arousal, jnp.float32),
        jnp.asarray(intensity, jnp.float32),
    ])
    emb2 = jnp.tile(jnp.asarray(emb_row, jnp.float32).reshape(1, h), (1, k))  # (1, w)

    tm = _pick_block_rows(rows_f, w * xf.dtype.itemsize)
    grid = (pl.cdiv(rows_f, tm),)

    y = pl.pallas_call(
        _modulate_kernel,
        out_shape=jax.ShapeDtypeStruct((rows_f, w), x.dtype),
        grid_spec=pltpu.PrefetchScalarGridSpec(
            num_scalar_prefetch=0,
            grid=grid,
            in_specs=[
                pl.BlockSpec(memory_space=pltpu.MemorySpace.SMEM),   # params (scalars)
                pl.BlockSpec((1, w), lambda i: (0, 0)),              # embedding row (resident)
                pl.BlockSpec((tm, w), lambda i: (i, 0)),             # x tile
            ],
            out_specs=pl.BlockSpec((tm, w), lambda i: (i, 0)),
        ),
        compiler_params=pltpu.CompilerParams(dimension_semantics=("parallel",)),
    )(params, emb2, xf)

    return y.reshape(orig_shape)


@jax.jit
def emotion_influence(scores_row, trans_softmax):
    """Fused: transition mixing + argmax + max-prob in one device call."""
    probs = pl.pallas_call(
        _emotion_influence_kernel,
        out_shape=jax.ShapeDtypeStruct((1, N_EMOTIONS), jnp.float32),
        in_specs=[
            pl.BlockSpec(memory_space=pltpu.MemorySpace.VMEM),
            pl.BlockSpec(memory_space=pltpu.MemorySpace.VMEM),
        ],
        out_specs=pl.BlockSpec(memory_space=pltpu.MemorySpace.VMEM),
    )(scores_row, trans_softmax)
    p = probs[0]
    idx = jnp.argmax(p)
    return p, idx, p[idx]


# --------------------------------------------------------------------------------------
# Module-level wrappers mirroring the PyTorch classes
# --------------------------------------------------------------------------------------
class EmotionalState:
    def __init__(self):
        self.emotion_memory = deque(maxlen=5)
        self.current_emotion = None
        self.emotion_intensity = 0.0
        self.emotion_decay = 0.95

    def update_state(self, new_emotion, intensity=1.0):
        self.emotion_memory.append(self.current_emotion)
        self.current_emotion = new_emotion
        self.emotion_intensity = intensity

    def decay_emotion(self):
        self.emotion_intensity *= self.emotion_decay


class EmotionalLayerPallas:
    EMOTION_VA_MAP = EMOTION_VA_MAP

    def __init__(self, hidden_dim, key):
        k_emb, k_trans = jax.random.split(key)
        self.hidden_dim = hidden_dim
        self.valence = jnp.float32(0.0)
        self.arousal = jnp.float32(0.0)
        self.emotional_state = EmotionalState()
        # nn.Embedding / nn.Parameter(torch.randn) default init: standard normal.
        self.emotion_embedding = jax.random.normal(k_emb, (N_EMOTIONS, hidden_dim), jnp.float32)
        self.transition_matrix = jax.random.normal(k_trans, (N_EMOTIONS, N_EMOTIONS), jnp.float32)
        # Row-softmax of the transition matrix depends only on parameters: cache it.
        self._transition_softmax = jax.nn.softmax(self.transition_matrix, axis=1)

    def map_emotion_to_valence_arousal(self, emotion_label):
        return self.EMOTION_VA_MAP.get(emotion_label, (0.0, 0.0))

    def compute_emotion_influence(self, x, emotion_dict):
        scores = np.zeros((1, N_EMOTIONS), np.float32)        # lane-major row
        for label, score in emotion_dict.items():
            if label in self.EMOTION_VA_MAP:
                scores[0, EMOTION_LABELS.index(label)] = score
        probs, idx, max_prob = jax.device_get(
            emotion_influence(jnp.asarray(scores), self._transition_softmax)
        )                                                      # single host sync
        self.emotional_state.update_state(int(idx), float(max_prob))
        return probs

    def __call__(self, x, emotion_input=None):
        if emotion_input is not None:
            emotion_dict = {item['label']: item['score'] for item in emotion_input}
            self.compute_emotion_influence(x, emotion_dict)
            dominant = max(emotion_dict.items(), key=lambda kv: kv[1])[0]
            v, a = self.map_emotion_to_valence_arousal(dominant)
            self.valence = jnp.float32(v)
            self.arousal = jnp.float32(a)
        if self.emotional_state.current_emotion is not None:
            emb_row = self.emotion_embedding[self.emotional_state.current_emotion]
            intensity = float(self.emotional_state.emotion_intensity)
        else:
            emb_row = jnp.zeros((self.hidden_dim,), jnp.float32)
            intensity = 0.0
        return emotional_modulate(x, self.valence, self.arousal, emb_row, intensity)


# --------------------------------------------------------------------------------------
# Pure numpy reference for validation
# --------------------------------------------------------------------------------------
def reference_forward(x, valence, arousal, emb_table, trans,
                      state_emotion, state_intensity, emotion_input=None):
    valence = float(valence)
    arousal = float(arousal)
    if emotion_input is not None:
        emotion_dict = {item['label']: item['score'] for item in emotion_input}
        ev = np.zeros(N_EMOTIONS, np.float32)
        for label, score in emotion_dict.items():
            if label in EMOTION_VA_MAP:
                ev[EMOTION_LABELS.index(label)] = score
        ev = np.exp(ev - ev.max()); ev = ev / ev.sum()
        t = np.asarray(trans, np.float32)
        t = np.exp(t - t.max(axis=1, keepdims=True)); t = t / t.sum(axis=1, keepdims=True)
        probs = ev @ t
        idx = int(np.argmax(probs))
        state_emotion, state_intensity = idx, float(probs[idx])
        dominant = max(emotion_dict.items(), key=lambda kv: kv[1])[0]
        valence, arousal = EMOTION_VA_MAP.get(dominant, (0.0, 0.0))
    gain = 1.0 / (1.0 + np.exp(-arousal))
    mod = 1.0 + valence * gain
    xf = np.asarray(x, np.float32)
    if state_emotion is not None:
        xf = xf + np.asarray(emb_table, np.float32)[state_emotion] * state_intensity
    return (xf * mod).astype(np.asarray(x).dtype), state_emotion, state_intensity


if __name__ == "__main__":
    key = jax.random.PRNGKey(0)
    k_x, k_mod, k_x2, k_mod2 = jax.random.split(key, 4)
    hidden_dim = 32
    x = jax.random.normal(k_x, (2, 8, hidden_dim), dtype=jnp.float32)   # (batch, seq, hidden)

    layer = EmotionalLayerPallas(hidden_dim, k_mod)

    # Call 1: no emotion input, no current emotion -> pure modulation (identity here).
    y1 = jax.block_until_ready(layer(x))
    ref1, _, _ = reference_forward(x, 0.0, 0.0, layer.emotion_embedding,
                                   layer.transition_matrix, None, 0.0)
    np.testing.assert_allclose(np.asarray(y1), ref1, rtol=2e-5, atol=1e-5)

    # Call 2: classifier output drives transition mixing, valence/arousal and the
    # embedding-context add (lane-folded path: 16 rows x 32 -> 4 rows x 128).
    emotion_input = [{'label': 'joy', 'score': 0.9},
                     {'label': 'surprise', 'score': 0.3},
                     {'label': 'sadness', 'score': 0.1}]
    y2 = jax.block_until_ready(layer(x, emotion_input))
    ref2, ref_idx, ref_int = reference_forward(x, 0.0, 0.0, layer.emotion_embedding,
                                               layer.transition_matrix, None, 0.0,
                                               emotion_input=emotion_input)
    np.testing.assert_allclose(np.asarray(y2), ref2, rtol=2e-5, atol=1e-5)
    assert layer.emotional_state.current_emotion == ref_idx
    np.testing.assert_allclose(layer.emotional_state.emotion_intensity, ref_int,
                               rtol=2e-5, atol=1e-6)

    # Call 3: exercise the non-foldable fallback layout (rows % k != 0, H % 128 != 0).
    layer2 = EmotionalLayerPallas(48, k_mod2)
    x3 = jax.random.normal(k_x2, (3, 5, 48), dtype=jnp.float32)
    y3 = jax.block_until_ready(layer2(x3))
    ref3, _, _ = reference_forward(x3, 0.0, 0.0, layer2.emotion_embedding,
                                   layer2.transition_matrix, None, 0.0)
    np.testing.assert_allclose(np.asarray(y3), ref3, rtol=2e-5, atol=1e-5)

    print("KERNEL_OK")
</pallas_src>

<mosaic_0001>
module attributes {stable_mosaic.version = 11 : i64} {
  func.func @_modulate_kernel(%arg0: i32, %arg1: memref<3xf32, #tpu.memory_space<smem>>, %arg2: memref<1x128xf32, #tpu.memory_space<vmem>>, %arg3: memref<4x128xf32, #tpu.memory_space<vmem>>, %arg4: memref<4x128xf32, #tpu.memory_space<vmem>>) attributes {dimension_semantics = [#tpu.dimension_semantics<parallel>], iteration_bounds = array<i64: 1>, scalar_prefetch = 0 : i64, scratch_operands = 0 : i64, tpu.core_type = #tpu.core_type<tc>, window_params = [{transform_indices = @transform_0, window_bounds = array<i64: 3>}, {pipeline_mode = #tpu.pipeline_mode<synchronous>, transform_indices = @transform_1, window_bounds = array<i64: 1, 128>}, {transform_indices = @transform_2, window_bounds = array<i64: 4, 128>}, {transform_indices = @transform_3, window_bounds = array<i64: 4, 128>}]} {
    %c0 = arith.constant 0 : index
    %0 = memref.load %arg1[%c0] : memref<3xf32, #tpu.memory_space<smem>>
    %c1 = arith.constant 1 : index
    %1 = memref.load %arg1[%c1] : memref<3xf32, #tpu.memory_space<smem>>
    %c2 = arith.constant 2 : index
    %2 = memref.load %arg1[%c2] : memref<3xf32, #tpu.memory_space<smem>>
    %cst = arith.constant 1.000000e+00 : f32
    %3 = vector.broadcast %cst : f32 to vector<1x1xf32>
    %4 = vector.broadcast %1 : f32 to vector<1x1xf32>
    %5 = arith.mulf %4, %3 : vector<1x1xf32>
    %cst_0 = arith.constant 0.000000e+00 : f32
    %6 = vector.broadcast %cst_0 : f32 to vector<1x1xf32>
    %7 = arith.subf %6, %5 : vector<1x1xf32>
    %8 = math.exp %7 : vector<1x1xf32>
    %cst_1 = arith.constant 1.000000e+00 : f32
    %9 = vector.broadcast %cst_1 : f32 to vector<1x1xf32>
    %10 = arith.addf %9, %8 : vector<1x1xf32>
    %cst_2 = arith.constant 1.000000e+00 : f32
    %11 = vector.broadcast %cst_2 : f32 to vector<1x1xf32>
    %12 = arith.divf %11, %10 : vector<1x1xf32>
    %13 = vector.broadcast %0 : f32 to vector<1x1xf32>
    %14 = arith.mulf %13, %12 : vector<1x1xf32>
    %cst_3 = arith.constant 1.000000e+00 : f32
    %15 = vector.broadcast %cst_3 : f32 to vector<1x1xf32>
    %16 = arith.addf %15, %14 : vector<1x1xf32>
    %c0_4 = arith.constant 0 : index
    %c0_5 = arith.constant 0 : index
    %17 = vector.load %arg2[%c0_4, %c0_5] : memref<1x128xf32, #tpu.memory_space<vmem>>, vector<1x128xf32>
    %18 = vector.broadcast %2 : f32 to vector<1x128xf32>
    %19 = arith.mulf %17, %18 : vector<1x128xf32>
    %c0_6 = arith.constant 0 : index
    %c0_7 = arith.constant 0 : index
    %20 = vector.load %arg3[%c0_6, %c0_7] : memref<4x128xf32, #tpu.memory_space<vmem>>, vector<4x128xf32>
    %21 = vector.broadcast %19 : vector<1x128xf32> to vector<4x128xf32>
    %22 = arith.addf %20, %21 : vector<4x128xf32>
    %23 = vector.broadcast %16 : vector<1x1xf32> to vector<4x128xf32>
    %24 = arith.mulf %22, %23 : vector<4x128xf32>
    %c0_8 = arith.constant 0 : index
    %c0_9 = arith.constant 0 : index
    %25 = vector.load %arg4[%c0_8, %c0_9] : memref<4x128xf32, #tpu.memory_space<vmem>>, vector<4x128xf32>
    tpu.vector_store %arg4[%c0_8, %c0_9], %24 {strides = array<i32>} : memref<4x128xf32, #tpu.memory_space<vmem>>, vector<4x128xf32>,
    return
  }
  func.func @transform_0(%arg0: i32) -> i32 {
    %c0_i32 = arith.constant 0 : i32
    %c0_i32_0 = arith.constant 0 : i32
    return %c0_i32 : i32
  }
  func.func @transform_1(%arg0: i32) -> (i32, i32) {
    %c0_i32 = arith.constant 0 : i32
    %c0_i32_0 = arith.constant 0 : i32
    %c0_i32_1 = arith.constant 0 : i32
    return %c0_i32, %c0_i32_0 : i32, i32
  }
  func.func @transform_2(%arg0: i32) -> (i32, i32) {
    %c0_i32 = arith.constant 0 : i32
    %c0_i32_0 = arith.constant 0 : i32
    return %arg0, %c0_i32 : i32, i32
  }
  func.func @transform_3(%arg0: i32) -> (i32, i32) {
    %c0_i32 = arith.constant 0 : i32
    %c0_i32_0 = arith.constant 0 : i32
    return %arg0, %c0_i32 : i32, i32
  }
}

</mosaic_0001>

<bundles_post_ra>
// kernel: emotional_modulate.1
= control target key start
LH: loop header
LB: loop body
LE: loop exit
PB: predicated region body
PF: predicated region fallthrough
CT: control target
= control target key end

     0   :  { %8 = vsyncpa [#allocation3], 0  ;;  %s112_s0 = inlined_call_operand.vmem [shape: f32[3], index: 0, kind: input, shape index: {}]   ;;  %s113_s1 = inlined_call_operand.vmem [shape: f32[1,128], index: 1, kind: input, shape index: {}]   ;;  %s114_s2 = inlined_call_operand.vmem [shape: f32[4,128], index: 2, kind: input, shape index: {}]   ;;  %s115_s3 = inlined_call_operand.vmem [shape: f32[4,128], index: 3, kind: output, shape index: {}]  }
   0x1   :  { %s15_s14 = sshll.u32 %s112_s0, 4  ;;  %s16_s14 = int_to_ptr.vmem [resolvable:$true] %s15_s14 }
   0x2   :  { %s65_s15 = scalar_lea.vmem %s16_s14, 16  ;;  %p70_p1 = scmp.lt.s32.totalorder %s16_s14, %s16_s14 }
   0x3   :  { %p66_p0 = scmp.ne.s32.totalorder %s16_s14, %s65_s15  ;;  %p71_p2 = scmp.lt.s32.totalorder %s65_s15, %s65_s15 }
   0x5   :  { %p72_p3 = por %p71_p2, %p70_p1 }
   0x7   :  { %p73_p4 = pnand %p72_p3, %p66_p0 }
   0x9   :  { %76 = shalt.err (!%p73_p4)
}
   0xa   :  { %s79_s16 = smov [#allocation2]  }
   0xb   :  { %18 = dma.vmem_to_smem %s16_s14, 16, %s79_s16, [#allocation3]  }
   0xc   :  { %77 = dma.done.wait [#allocation3], 16  }
   0xd   :  { %78 = vsyncadd [#allocation3], 4294967280 }
   0xe   :  { %26 = sfence }
   0xf   :  { %s58_s17 = sld [smem:[#allocation2 + $0x1]]  ;;  %s59_s18 = sld [smem:[#allocation2 + $0x2]]  ;;  %v45_v3 = vlaneseq  ;;  %v40_v7 = vld [vmem:[%s113_s1] sm:$0x1] }
  0x10   :  { %s27_s0 = sld [smem:[#allocation2]]  ;;  %v43_v13 = vld [vmem:[%s114_s2] sm:$0xf] }
  0x11   :  { %v46_v6 = vshrl.u32 %v45_v3, 7 }
  0x13   :  { %v47_v10 = vsub.s32 0, %v46_v6 }
  0x15   :  { %v30_v0 = vstv %s58_s17  ;;  %v41_v8 = vstv %s59_s18 }
  0x16   :  { %v31_v1 = vsub.f32 0.0, %v30_v0  ;;  %v42_v9 = vmul.f32 %v41_v8, %v40_v7  ;;  %v37_v12 = vstv %s27_s0 }
  0x18   :  { %v32_v2 = vmul.f32 1.442695, %v31_v1  ;;  %v48_v11 = vrot.slane %v42_v9, %v47_v10 }
  0x1a   :  { %61 = vpow2.f32 %v32_v2  ;;  %v50_v16 = vadd.f32 %v48_v11, %v43_v13 }
  0x24   :  { %v62_v4 = vpop.eup %61 }
  0x25   :  { %v34_v5 = vadd.f32 1.0, %v62_v4 }
  0x27   :  { %63 = vrcp.f32 %v34_v5 }
  0x31   :  { %v64_v14 = vpop.eup %63 }
  0x32   :  { %v38_v15 = vmul.f32 %v64_v14, %v37_v12 }
  0x34   :  { %v39_v17 = vadd.f32 1.0, %v38_v15 }
  0x36   :  { %v51_v18 = vmul.f32 %v50_v16, %v39_v17 }
  0x38   :  { %52 = vst [vmem:[%s115_s3] sm:$0xf] %v51_v18 }
  0x39   :  { %57 = vsyncpa [#allocation3], 1 }

</bundles_post_ra>
